<compile_context>
chip_gen: v7x
topology: tpu7x:2x2x1
jax: 0.10.0
libtpu: 0.0.40
codegen_flags: <defaults>
</compile_context>

<pallas_src>
import jax
import jax.numpy as jnp
from jax.experimental import pallas as pl
from jax.experimental.pallas import tpu as pltpu

_LANE = 128
_BF16_SUBLANE = 16  # bf16 activations -> batch tile rounded to 16 sublanes


def _round_up(x, m):
    return ((x + m - 1) // m) * m


def _swish(x):
    # Swish(x) = x * sigmoid(x) = x / (1 + exp(-x)); exp and approx reciprocal both lower to
    # the EUP slot, essentially free next to the MXU work. (x = -inf would give NaN; finite
    # large-negative x correctly saturates to 0.)
    return x * pl.reciprocal(1.0 + jnp.exp(-x), approx=True)


def policy_decoder_kernel(z_ref, w1_ref, b1_ref, w2_ref, b2_ref, w3_ref, b3_ref, o_ref):
    # z and all weights are bf16; dots accumulate in f32 (native bf16 MXU path on
    # v5e/v6e/v7x). Bias-add and Swish run in f32 on the VPU/EUP.
    z = z_ref[...]

    h = jnp.dot(z, w1_ref[...], preferred_element_type=jnp.float32)
    h = _swish(h + b1_ref[...])

    h = jnp.dot(h.astype(jnp.bfloat16), w2_ref[...], preferred_element_type=jnp.float32)
    h = _swish(h + b2_ref[...])

    out = jnp.dot(h.astype(jnp.bfloat16), w3_ref[...], preferred_element_type=jnp.float32)
    o_ref[...] = (out + b3_ref[...]).astype(o_ref.dtype)


def pack_params(params, latent_dim, hidden_dim, output_dim):
    """Zero-pad only the hidden dim to a multiple of 128 lanes; weights -> bf16, biases -> f32.

    Zero padding is exact: padded hidden columns get weight 0 and bias 0, Swish(0) = 0, and
    those zeros feed zero weight rows of the next layer. The latent (K of layer 1) and output
    dims keep their true sizes (block dim == full array dim is allowed by Pallas), avoiding
    dead HBM traffic on the input stream and a post-kernel output slice.
    """
    w1, b1, w2, b2, w3, b3 = params
    hp = _round_up(hidden_dim, _LANE)

    def pad_w(w, r, c):
        return jnp.pad(w, ((0, r - w.shape[0]), (0, c - w.shape[1]))).astype(jnp.bfloat16)

    def pad_b(b, c):
        b = b.reshape(1, -1)
        return jnp.pad(b, ((0, 0), (0, c - b.shape[1]))).astype(jnp.float32)

    packed = (pad_w(w1, latent_dim, hp), pad_b(b1, hp),
              pad_w(w2, hp, hp), pad_b(b2, hp),
              pad_w(w3, hp, output_dim), pad_b(b3, output_dim))
    return packed, hp


def policy_decoder(z, params, *, max_block_b=512):
    """Fused MLP forward matching PolicyDecoder: Linear->Swish->Linear->Swish->Linear."""
    B, latent_dim = z.shape
    hidden_dim = params[0].shape[1]
    output_dim = params[4].shape[1]

    packed, hp = pack_params(params, latent_dim, hidden_dim, output_dim)
    w1p, b1p, w2p, b2p, w3p, b3p = packed

    # Balanced batch tiles: minimal dead-row padding, and >= 2 grid steps once B >= 32 so the
    # "parallel" axis can shard across v7x's two TensorCores (and DMA/compute can pipeline).
    n_tiles = pl.cdiv(B, max_block_b)
    if B >= 2 * _BF16_SUBLANE and n_tiles < 2:
        n_tiles = 2
    block_b = _round_up(pl.cdiv(B, n_tiles), _BF16_SUBLANE)
    grid_b = pl.cdiv(B, block_b)
    b_pad = grid_b * block_b

    z_p = z.astype(jnp.bfloat16)
    if b_pad != B:
        z_p = jnp.pad(z_p, ((0, b_pad - B), (0, 0)))

    # VMEM budget: z/out tiles double-buffered, weights & biases single-buffered
    # (pl.Buffered(1)), plus headroom for the live f32 intermediate h and its bf16 copy.
    weight_bytes = (latent_dim * hp + hp * hp + hp * output_dim) * 2      # bf16
    bias_bytes = (2 * hp + output_dim) * 4                                # f32
    io_bytes = 2 * (block_b * latent_dim * 2 + block_b * output_dim * 4)  # double-buffered
    act_bytes = 3 * block_b * hp * 4                                      # h f32 + bf16 + tmp
    budget = weight_bytes + bias_bytes + io_bytes + act_bytes
    vmem_limit = int(min(64 << 20, max(budget + (2 << 20), 8 << 20)))

    cost = pl.CostEstimate(
        flops=2 * b_pad * (latent_dim * hp + hp * hp + hp * output_dim),
        transcendentals=2 * b_pad * hp,   # one exp per Swish activation, two Swish layers
        bytes_accessed=(z_p.size * 2
                        + sum(p.size * p.dtype.itemsize for p in packed)
                        + b_pad * output_dim * 4),
    )

    resident = dict(pipeline_mode=pl.Buffered(1))  # constant blocks: no double-buffering

    out_p = pl.pallas_call(
        policy_decoder_kernel,
        out_shape=jax.ShapeDtypeStruct((b_pad, output_dim), z.dtype),
        grid_spec=pltpu.PrefetchScalarGridSpec(
            num_scalar_prefetch=0,
            grid=(grid_b,),
            in_specs=[
                # activation batch tile (bf16, true latent width)
                pl.BlockSpec((block_b, latent_dim), lambda i: (i, 0)),
                # weights / biases: full arrays, resident and single-buffered
                pl.BlockSpec((latent_dim, hp), lambda i: (0, 0), **resident),
                pl.BlockSpec((1, hp), lambda i: (0, 0), **resident),
                pl.BlockSpec((hp, hp), lambda i: (0, 0), **resident),
                pl.BlockSpec((1, hp), lambda i: (0, 0), **resident),
                pl.BlockSpec((hp, output_dim), lambda i: (0, 0), **resident),
                pl.BlockSpec((1, output_dim), lambda i: (0, 0), **resident),
            ],
            out_specs=pl.BlockSpec((block_b, output_dim), lambda i: (i, 0)),
        ),
        compiler_params=pltpu.CompilerParams(
            dimension_semantics=("parallel",),   # batch-parallel -> megacore / dual-TC
            vmem_limit_bytes=vmem_limit,
        ),
        cost_estimate=cost,
    )(z_p, w1p, b1p, w2p, b2p, w3p, b3p)

    return out_p if b_pad == B else out_p[:B]


def init_params(key, latent_dim, hidden_dim, output_dim, dtype=jnp.float32):
    """nn.Linear-style uniform(-1/sqrt(fan_in), +1/sqrt(fan_in)) init.

    Weights stored as (in_features, out_features) = transpose of PyTorch's layout.
    """
    ks = jax.random.split(key, 6)

    def linear(kw, kb, fan_in, fan_out):
        bound = 1.0 / float(fan_in) ** 0.5
        w = jax.random.uniform(kw, (fan_in, fan_out), dtype, -bound, bound)
        b = jax.random.uniform(kb, (1, fan_out), dtype, -bound, bound)
        return w, b

    w1, b1 = linear(ks[0], ks[1], latent_dim, hidden_dim)
    w2, b2 = linear(ks[2], ks[3], hidden_dim, hidden_dim)
    w3, b3 = linear(ks[4], ks[5], hidden_dim, output_dim)
    return (w1, b1, w2, b2, w3, b3)


def policy_decoder_ref(z, params):
    """Pure-JAX reference modeling the same bf16 operand truncation the kernel applies."""
    w1, b1, w2, b2, w3, b3 = params

    def mm(a, b):
        return jnp.dot(a.astype(jnp.bfloat16), b.astype(jnp.bfloat16),
                       preferred_element_type=jnp.float32)

    def swish(x):
        return x * (1.0 / (1.0 + jnp.exp(-x)))

    h = swish(mm(z, w1) + b1)
    h = swish(mm(h, w2) + b2)
    return mm(h, w3) + b3


if __name__ == "__main__":
    # Small shapes consistent with the module: z is (batch, latent_dim).
    batch, latent_dim, hidden_dim, output_dim = 16, 32, 64, 16

    key = jax.random.PRNGKey(0)
    k_z, k_p = jax.random.split(key)
    z = jax.random.normal(k_z, (batch, latent_dim), jnp.float32)
    params = init_params(k_p, latent_dim, hidden_dim, output_dim)

    out = jax.block_until_ready(policy_decoder(z, params))
    ref = policy_decoder_ref(z, params)

    assert out.shape == (batch, output_dim)
    # bf16 MXU operands + approx-EUP reciprocal -> compare against a bf16-truncating ref
    # with a tolerance that covers the approximate reciprocal.
    assert jnp.allclose(out, ref, atol=2e-2, rtol=2e-2), "mismatch vs reference"

    print("KERNEL_OK")
</pallas_src>

<mosaic_0001>
module attributes {stable_mosaic.version = 11 : i64} {
  func.func @policy_decoder_kernel(%arg0: i32, %arg1: memref<16x32xbf16, #tpu.memory_space<vmem>>, %arg2: memref<32x128xbf16, #tpu.memory_space<vmem>>, %arg3: memref<1x128xf32, #tpu.memory_space<vmem>>, %arg4: memref<128x128xbf16, #tpu.memory_space<vmem>>, %arg5: memref<1x128xf32, #tpu.memory_space<vmem>>, %arg6: memref<128x16xbf16, #tpu.memory_space<vmem>>, %arg7: memref<1x16xf32, #tpu.memory_space<vmem>>, %arg8: memref<16x16xf32, #tpu.memory_space<vmem>>) attributes {dimension_semantics = [#tpu.dimension_semantics<parallel>], iteration_bounds = array<i64: 1>, scalar_prefetch = 0 : i64, scratch_operands = 0 : i64, tpu.core_type = #tpu.core_type<tc>, window_params = [{transform_indices = @transform_0, window_bounds = array<i64: 16, 32>}, {pipeline_mode = #tpu.pipeline_mode<synchronous>, transform_indices = @transform_1, window_bounds = array<i64: 32, 128>}, {pipeline_mode = #tpu.pipeline_mode<synchronous>, transform_indices = @transform_2, window_bounds = array<i64: 1, 128>}, {pipeline_mode = #tpu.pipeline_mode<synchronous>, transform_indices = @transform_3, window_bounds = array<i64: 128, 128>}, {pipeline_mode = #tpu.pipeline_mode<synchronous>, transform_indices = @transform_4, window_bounds = array<i64: 1, 128>}, {pipeline_mode = #tpu.pipeline_mode<synchronous>, transform_indices = @transform_5, window_bounds = array<i64: 128, 16>}, {pipeline_mode = #tpu.pipeline_mode<synchronous>, transform_indices = @transform_6, window_bounds = array<i64: 1, 16>}, {transform_indices = @transform_7, window_bounds = array<i64: 16, 16>}]} {
    %c0 = arith.constant 0 : index
    %c0_0 = arith.constant 0 : index
    %0 = vector.load %arg1[%c0, %c0_0] : memref<16x32xbf16, #tpu.memory_space<vmem>>, vector<16x32xbf16>
    %c0_1 = arith.constant 0 : index
    %c0_2 = arith.constant 0 : index
    %1 = vector.load %arg2[%c0_1, %c0_2] : memref<32x128xbf16, #tpu.memory_space<vmem>>, vector<32x128xbf16>
    %cst = arith.constant dense<0.000000e+00> : vector<16x128xf32>
    %2 = tpu.matmul %0, %1, %cst {dimension_numbers = #tpu.dot_dimension_numbers<[1], [0], [0], [1], [0, 0, 1, 1], [], []>} : vector<16x32xbf16>, vector<32x128xbf16>, vector<16x128xf32> -> vector<16x128xf32>
    %c0_3 = arith.constant 0 : index
    %c0_4 = arith.constant 0 : index
    %3 = vector.load %arg3[%c0_3, %c0_4] : memref<1x128xf32, #tpu.memory_space<vmem>>, vector<1x128xf32>
    %4 = vector.broadcast %3 : vector<1x128xf32> to vector<16x128xf32>
    %5 = arith.addf %2, %4 : vector<16x128xf32>
    %cst_5 = arith.constant 0.000000e+00 : f32
    %6 = vector.broadcast %cst_5 : f32 to vector<16x128xf32>
    %7 = arith.subf %6, %5 : vector<16x128xf32>
    %8 = math.exp %7 : vector<16x128xf32>
    %cst_6 = arith.constant 1.000000e+00 : f32
    %9 = vector.broadcast %cst_6 : f32 to vector<16x128xf32>
    %10 = arith.addf %9, %8 : vector<16x128xf32>
    %11 = tpu.reciprocal %10 {approx = true} : vector<16x128xf32> -> vector<16x128xf32>
    %12 = arith.mulf %5, %11 : vector<16x128xf32>
    %13 = arith.truncf %12 : vector<16x128xf32> to vector<16x128xbf16>
    %c0_7 = arith.constant 0 : index
    %c0_8 = arith.constant 0 : index
    %14 = vector.load %arg4[%c0_7, %c0_8] : memref<128x128xbf16, #tpu.memory_space<vmem>>, vector<128x128xbf16>
    %cst_9 = arith.constant dense<0.000000e+00> : vector<16x128xf32>
    %15 = tpu.matmul %13, %14, %cst_9 {dimension_numbers = #tpu.dot_dimension_numbers<[1], [0], [0], [1], [0, 0, 1, 1], [], []>} : vector<16x128xbf16>, vector<128x128xbf16>, vector<16x128xf32> -> vector<16x128xf32>
    %c0_10 = arith.constant 0 : index
    %c0_11 = arith.constant 0 : index
    %16 = vector.load %arg5[%c0_10, %c0_11] : memref<1x128xf32, #tpu.memory_space<vmem>>, vector<1x128xf32>
    %17 = vector.broadcast %16 : vector<1x128xf32> to vector<16x128xf32>
    %18 = arith.addf %15, %17 : vector<16x128xf32>
    %cst_12 = arith.constant 0.000000e+00 : f32
    %19 = vector.broadcast %cst_12 : f32 to vector<16x128xf32>
    %20 = arith.subf %19, %18 : vector<16x128xf32>
    %21 = math.exp %20 : vector<16x128xf32>
    %cst_13 = arith.constant 1.000000e+00 : f32
    %22 = vector.broadcast %cst_13 : f32 to vector<16x128xf32>
    %23 = arith.addf %22, %21 : vector<16x128xf32>
    %24 = tpu.reciprocal %23 {approx = true} : vector<16x128xf32> -> vector<16x128xf32>
    %25 = arith.mulf %18, %24 : vector<16x128xf32>
    %26 = arith.truncf %25 : vector<16x128xf32> to vector<16x128xbf16>
    %c0_14 = arith.constant 0 : index
    %c0_15 = arith.constant 0 : index
    %27 = vector.load %arg6[%c0_14, %c0_15] : memref<128x16xbf16, #tpu.memory_space<vmem>>, vector<128x16xbf16>
    %cst_16 = arith.constant dense<0.000000e+00> : vector<16x16xf32>
    %28 = tpu.matmul %26, %27, %cst_16 {dimension_numbers = #tpu.dot_dimension_numbers<[1], [0], [0], [1], [0, 0, 1, 1], [], []>} : vector<16x128xbf16>, vector<128x16xbf16>, vector<16x16xf32> -> vector<16x16xf32>
    %c0_17 = arith.constant 0 : index
    %c0_18 = arith.constant 0 : index
    %29 = vector.load %arg7[%c0_17, %c0_18] : memref<1x16xf32, #tpu.memory_space<vmem>>, vector<1x16xf32>
    %30 = vector.broadcast %29 : vector<1x16xf32> to vector<16x16xf32>
    %31 = arith.addf %28, %30 : vector<16x16xf32>
    %c0_19 = arith.constant 0 : index
    %c0_20 = arith.constant 0 : index
    %32 = vector.load %arg8[%c0_19, %c0_20] : memref<16x16xf32, #tpu.memory_space<vmem>>, vector<16x16xf32>
    tpu.vector_store %arg8[%c0_19, %c0_20], %31 {strides = array<i32>} : memref<16x16xf32, #tpu.memory_space<vmem>>, vector<16x16xf32>,
    return
  }
  func.func @transform_0(%arg0: i32) -> (i32, i32) {
    %c0_i32 = arith.constant 0 : i32
    %c0_i32_0 = arith.constant 0 : i32
    return %arg0, %c0_i32 : i32, i32
  }
  func.func @transform_1(%arg0: i32) -> (i32, i32) {
    %c0_i32 = arith.constant 0 : i32
    %c0_i32_0 = arith.constant 0 : i32
    %c0_i32_1 = arith.constant 0 : i32
    return %c0_i32, %c0_i32_0 : i32, i32
  }
  func.func @transform_2(%arg0: i32) -> (i32, i32) {
    %c0_i32 = arith.constant 0 : i32
    %c0_i32_0 = arith.constant 0 : i32
    %c0_i32_1 = arith.constant 0 : i32
    return %c0_i32, %c0_i32_0 : i32, i32
  }
  func.func @transform_3(%arg0: i32) -> (i32, i32) {
    %c0_i32 = arith.constant 0 : i32
    %c0_i32_0 = arith.constant 0 : i32
    %c0_i32_1 = arith.constant 0 : i32
    return %c0_i32, %c0_i32_0 : i32, i32
  }
  func.func @transform_4(%arg0: i32) -> (i32, i32) {
    %c0_i32 = arith.constant 0 : i32
    %c0_i32_0 = arith.constant 0 : i32
    %c0_i32_1 = arith.constant 0 : i32
    return %c0_i32, %c0_i32_0 : i32, i32
  }
  func.func @transform_5(%arg0: i32) -> (i32, i32) {
    %c0_i32 = arith.constant 0 : i32
    %c0_i32_0 = arith.constant 0 : i32
    %c0_i32_1 = arith.constant 0 : i32
    return %c0_i32, %c0_i32_0 : i32, i32
  }
  func.func @transform_6(%arg0: i32) -> (i32, i32) {
    %c0_i32 = arith.constant 0 : i32
    %c0_i32_0 = arith.constant 0 : i32
    %c0_i32_1 = arith.constant 0 : i32
    return %c0_i32, %c0_i32_0 : i32, i32
  }
  func.func @transform_7(%arg0: i32) -> (i32, i32) {
    %c0_i32 = arith.constant 0 : i32
    %c0_i32_0 = arith.constant 0 : i32
    return %arg0, %c0_i32 : i32, i32
  }
}

</mosaic_0001>

<bundles_post_ra>
// kernel: tpu_custom_call.1
= control target key start
LH: loop header
LB: loop body
LE: loop exit
PB: predicated region body
PF: predicated region fallthrough
CT: control target
= control target key end

     0   :  { %12 = vsyncpa [#allocation3], 0  ;;  %s726_s0 = inlined_call_operand.hbm [shape: bf16[16,32], index: 0, kind: input, shape index: {}]   ;;  %s727_s1 = inlined_call_operand.vmem [shape: bf16[32,128], index: 1, kind: input, shape index: {}]   ;;  %s728_s2 = inlined_call_operand.vmem [shape: f32[1,128], index: 2, kind: input, shape index: {}]   ;;  %s729_s3 = inlined_call_operand.vmem [shape: bf16[128,128], index: 3, kind: input, shape index: {}]   ;;  %s730_s4 = inlined_call_operand.vmem [shape: f32[1,128], index: 4, kind: input, shape index: {}]   ;;  %s731_s5 = inlined_call_operand.vmem [shape: bf16[128,16], index: 5, kind: input, shape index: {}]   ;;  %s732_s6 = inlined_call_operand.vmem [shape: f32[1,16], index: 6, kind: input, shape index: {}]   ;;  %s733_s7 = inlined_call_operand.hbm [shape: f32[16,16], index: 7, kind: output, shape index: {}]  }
   0x1   :  { %13 = vsyncpa [#allocation4], 0  ;;  %s570_s24 = smov [#allocation2]   ;;  %s522_s28 = scalar_lea.hbm %s726_s0, 128 }
   0x2   :  { %s19_s25 = sshll.u32 %s570_s24, 4  ;;  %p523_p0 = scmp.ne.s32.totalorder %s726_s0, %s522_s28  ;;  %s20_s25 = int_to_ptr.vmem [resolvable:$true] %s19_s25 }
   0x3   :  { %p526_p1 = scmp.lt.u32.totalorder %s522_s28, %s726_s0 }
   0x5   :  { %p528_p2 = pnand %p526_p1, %p523_p0 }
   0x7   :  { %531 = shalt.err (!%p528_p2)
}
   0x8   :  { %s532_s10 = scalar_lea.vmem %s20_s25, 128  ;;  %p537_p4 = scmp.lt.s32.totalorder %s20_s25, %s20_s25 }
   0x9   :  { %p533_p3 = scmp.ne.s32.totalorder %s20_s25, %s532_s10  ;;  %p538_p5 = scmp.lt.s32.totalorder %s532_s10, %s532_s10 }
   0xb   :  { %p539_p6 = por %p538_p5, %p537_p4 }
   0xd   :  { %p540_p7 = pnand %p539_p6, %p533_p3 }
   0xf   :  { %543 = shalt.err (!%p540_p7)
}
  0x10   :  { %s571_s11 = smov 64   ;;  %s572_s12 = smov 4  }
  0x11   :  { %25 = dma.hbm_to_vmem [thread:$0]  %s726_s0, 128, %s20_s25, [#allocation3], %s571_s11, %s571_s11, %s572_s12  }
  0x12   :  { %566 = dma.done.wait [#allocation3], 128  }
  0x13   :  { %567 = vsyncadd [#allocation3], 4294967168  ;;  %v573_v0 = vmov 0.0   ;;  %vm574_vm0 = vmmov 0   ;;  %v487_v1 = vld [vmem:[%s727_s1] sm:$0xff]   ;;  %v488_v2 = vld [vmem:[%s727_s1 + $0x8] sm:$0xff]  }
  0x14   :  { %431 = vmatprep.subr.bf16.mxu0 %v573_v0  ;;  %435 = vmatprep.mubr.msk.bf16.mxu0 %vm574_vm0, %v573_v0  ;;  %v489_v3 = vld [vmem:[#allocation2] sm:$0xff]   ;;  %vm72_vm1 = vcmask 261120   ;;  %v491_v5 = vld [vmem:[%s729_s3 + $0x8] sm:$0xff]   ;;  %v492_v6 = vld [vmem:[%s729_s3 + $0x10] sm:$0xff]   ;;  %s575_s26 = smov [#allocation5]   ;;  %vm367_vm2 = vcmask 130048  }
  0x15   :  { %439 = vmatprep.subr.bf16.mxu1 %v573_v0  ;;  %455 = vmatprep.mubr.msk.bf16.mxu1 %vm574_vm0, %v573_v0  ;;  %v490_v4 = vld [vmem:[%s729_s3] sm:$0xff]   ;;  %v493_v7 = vld [vmem:[%s729_s3 + $0x18] sm:$0xff]   ;;  %v495_v9 = vld [vmem:[%s729_s3 + $0x28] sm:$0xff]   ;;  %s375_s27 = sshll.u32 %s575_s26, 4  ;;  %s376_s27 = int_to_ptr.vmem [resolvable:$true] %s375_s27 }
  0x16   :  { %432 = vmatpush3.bf16.msra.mxu0 %v487_v1  ;;  %440 = vmatpush3.bf16.msra.mxu1 %v490_v4  ;;  %v494_v8 = vld [vmem:[%s729_s3 + $0x20] sm:$0xff]   ;;  %v496_v10 = vld [vmem:[%s729_s3 + $0x30] sm:$0xff]   ;;  %v497_v11 = vld [vmem:[%s729_s3 + $0x38] sm:$0xff]   ;;  %s544_s28 = scalar_lea.vmem %s376_s27, 256  ;;  %p549_p9 = scmp.lt.s32.totalorder %s376_s27, %s376_s27 }
  0x17   :  { %433 = vmatprep.subr.bf16.mxu0 %v573_v0  ;;  %441 = vmatprep.subr.bf16.mxu1 %v573_v0  ;;  %v387_v12 = vld [vmem:[%s728_s2] ss:$0 sm:$0xff]  ;;  %v499_v33 = vld [vmem:[%s731_s5 + $0x8] sm:$0xff]   ;;  %v500_v34 = vld [vmem:[%s731_s5 + $0x10] sm:$0xff]   ;;  %p545_p8 = scmp.ne.s32.totalorder %s376_s27, %s544_s28  ;;  %p550_p10 = scmp.lt.s32.totalorder %s544_s28, %s544_s28 }
  0x18   :  { %v498_v32 = vld [vmem:[%s731_s5] sm:$0xff]   ;;  %v501_v35 = vld [vmem:[%s731_s5 + $0x18] sm:$0xff]   ;;  %v503_v37 = vld [vmem:[%s731_s5 + $0x28] sm:$0xff]  }
  0x19   :  { %v502_v36 = vld [vmem:[%s731_s5 + $0x20] sm:$0xff]   ;;  %v504_v38 = vld [vmem:[%s731_s5 + $0x30] sm:$0xff]   ;;  %v505_v39 = vld [vmem:[%s731_s5 + $0x38] sm:$0xff]   ;;  %p551_p11 = por %p550_p10, %p549_p9 }
  0x1a   :  { %434 = vmatpush3.bf16.msra.mxu0 %v488_v2  ;;  %442 = vmatpush3.bf16.msra.mxu1 %v491_v5  ;;  %v392_v40 = vld [vmem:[%s730_s4] ss:$0 sm:$0xff] }
  0x1b   :  { %459 = vmatprep.subr.bf16.mxu0 %v573_v0  ;;  %443 = vmatprep.subr.bf16.mxu1 %v573_v0  ;;  %v401_v60 = vld [vmem:[%s732_s6] ss:$0 sm:$0xff]  ;;  %p552_p12 = pnand %p551_p11, %p545_p8 }
  0x1d   :  { %436 = vmatmul.mubr.msk.bf16.vlgmr.msra.gmra.mrb[0].mxu0 %vm72_vm1, %v489_v3 }
  0x1e   :  { %475 = vmatprep.mubr.msk.bf16.mxu0 %vm574_vm0, %v573_v0  ;;  %444 = vmatpush3.bf16.msra.mxu1 %v492_v6 }
  0x1f   :  { %445 = vmatprep.subr.bf16.mxu1 %v573_v0  ;;  %460 = vmatpush3.bf16.msra.mxu0 %v498_v32 }
  0x20   :  { %461 = vmatprep.subr.bf16.mxu0 %v573_v0 }
  0x22   :  { %446 = vmatpush3.bf16.msra.mxu1 %v493_v7 }
  0x23   :  { %447 = vmatprep.subr.bf16.mxu1 %v573_v0  ;;  %462 = vmatpush3.bf16.msra.mxu0 %v499_v33 }
  0x24   :  { %463 = vmatprep.subr.bf16.mxu0 %v573_v0 }
  0x26   :  { %448 = vmatpush3.bf16.msra.mxu1 %v494_v8 }
  0x27   :  { %449 = vmatprep.subr.bf16.mxu1 %v573_v0  ;;  %464 = vmatpush3.bf16.msra.mxu0 %v500_v34 }
  0x28   :  { %465 = vmatprep.subr.bf16.mxu0 %v573_v0 }
  0x2a   :  { %450 = vmatpush3.bf16.msra.mxu1 %v495_v9 }
  0x2b   :  { %451 = vmatprep.subr.bf16.mxu1 %v573_v0  ;;  %466 = vmatpush3.bf16.msra.mxu0 %v501_v35 }
  0x2c   :  { %467 = vmatprep.subr.bf16.mxu0 %v573_v0 }
  0x2e   :  { %452 = vmatpush3.bf16.msra.mxu1 %v496_v10 }
  0x2f   :  { %453 = vmatprep.subr.bf16.mxu1 %v573_v0  ;;  %468 = vmatpush3.bf16.msra.mxu0 %v502_v36 }
  0x30   :  { %469 = vmatprep.subr.bf16.mxu0 %v573_v0 }
  0x32   :  { %454 = vmatpush3.bf16.msra.mxu1 %v497_v11 }
  0x33   :  { %470 = vmatpush3.bf16.msra.mxu0 %v503_v37 }
  0x34   :  { %471 = vmatprep.subr.bf16.mxu0 %v573_v0 }
  0x37   :  { %472 = vmatpush3.bf16.msra.mxu0 %v504_v38 }
  0x38   :  { %473 = vmatprep.subr.bf16.mxu0 %v573_v0 }
  0x3b   :  { %474 = vmatpush3.bf16.msra.mxu0 %v505_v39 }
  0xf0   :  { %v110_v13 = vpop.f32.mrb[0].mxu0 }
  0xf1   :  { %v111_v14 = vadd.f32 %v387_v12, %v110_v13  ;;  %v437_v15 = vpop.f32.mrb[1].mxu0 }
  0xf2   :  { %v113_v16 = vpop.f32.mrb[2].mxu0 }
  0xf3   :  { %v117_v17 = vsub.f32 0.0, %v111_v14  ;;  %v114_v18 = vadd.f32 %v387_v12, %v113_v16  ;;  %v438_v19 = vpop.f32.mrb[3].mxu0 }
  0xf5   :  { %v119_v20 = vmul.f32 1.442695, %v117_v17  ;;  %v118_v21 = vsub.f32 0.0, %v114_v18 }
  0xf7   :  { %506 = vpow2.f32 %v119_v20  ;;  %v121_v22 = vmul.f32 1.442695, %v118_v21 }
  0xf9   :  { %508 = vpow2.f32 %v121_v22 }
 0x101   :  { %v507_v23 = vpop.eup %506 }
 0x102   :  { %v123_v24 = vadd.f32 1.0, %v507_v23 }
 0x103   :  { %v509_v25 = vpop.eup %508 }
 0x104   :  { %510 = vrcp.f32 %v123_v24  ;;  %v124_v26 = vadd.f32 1.0, %v509_v25 }
 0x106   :  { %512 = vrcp.f32 %v124_v26 }
 0x10e   :  { %v511_v27 = vpop.eup %510 }
 0x10f   :  { %v127_v29 = vmul.f32 %v511_v27, %v111_v14 }
 0x110   :  { %v513_v28 = vpop.eup %512 }
 0x111   :  { %v128_v30 = vmul.f32 %v513_v28, %v114_v18 }
 0x113   :  { %v129_v31 = vpack.c.bf16 %v128_v30, %v127_v29 }
 0x115   :  { %456 = vmatmul.mubr.bf16.vlgmr.msra.gmra.mrb[0].mxu1 %v129_v31 }
 0x1e8   :  { %v235_v41 = vpop.f32.mrb[0].mxu1 }
 0x1e9   :  { %v236_v42 = vadd.f32 %v392_v40, %v235_v41  ;;  %v457_v43 = vpop.f32.mrb[1].mxu1 }
 0x1ea   :  { %v238_v44 = vpop.f32.mrb[2].mxu1 }
 0x1eb   :  { %v242_v45 = vsub.f32 0.0, %v236_v42  ;;  %v239_v46 = vadd.f32 %v392_v40, %v238_v44  ;;  %v458_v47 = vpop.f32.mrb[3].mxu1 }
 0x1ed   :  { %v244_v48 = vmul.f32 1.442695, %v242_v45  ;;  %v243_v49 = vsub.f32 0.0, %v239_v46 }
 0x1ef   :  { %514 = vpow2.f32 %v244_v48  ;;  %v246_v50 = vmul.f32 1.442695, %v243_v49 }
 0x1f1   :  { %516 = vpow2.f32 %v246_v50 }
 0x1f9   :  { %v515_v51 = vpop.eup %514 }
 0x1fa   :  { %v248_v52 = vadd.f32 1.0, %v515_v51 }
 0x1fb   :  { %v517_v53 = vpop.eup %516 }
 0x1fc   :  { %518 = vrcp.f32 %v248_v52  ;;  %v249_v54 = vadd.f32 1.0, %v517_v53 }
 0x1fe   :  { %520 = vrcp.f32 %v249_v54 }
 0x206   :  { %v519_v55 = vpop.eup %518 }
 0x207   :  { %v252_v57 = vmul.f32 %v519_v55, %v236_v42 }
 0x208   :  { %v521_v56 = vpop.eup %520 }
 0x209   :  { %v253_v58 = vmul.f32 %v521_v56, %v239_v46 }
 0x20b   :  { %v254_v59 = vpack.c.bf16 %v253_v58, %v252_v57 }
 0x20d   :  { %476 = vmatmul.mubr.bf16.vlgmr.msra.gmra.mrb[4].mxu0 %v254_v59 }
 0x2e0   :  { %v360_v61 = vpop.f32.mrb[4].mxu0 }
 0x2e1   :  { %v361_v62 = vadd.f32 %v401_v60, %v360_v61  ;;  %v477_v63 = vpop.f32.mrb[5].mxu0 }
 0x2e2   :  { %v363_v0 = vpop.f32.mrb[6].mxu0 }
 0x2e3   :  { %368 = vst.msk [vmem:[#allocation5] sm:$0xff] %vm367_vm2, %v361_v62  ;;  %v364_v1 = vadd.f32 %v401_v60, %v363_v0  ;;  %v478_v2 = vpop.f32.mrb[7].mxu0 }
 0x2e5   :  { %369 = vst.msk [vmem:[#allocation5 + $0x8] sm:$0xff] %vm367_vm2, %v364_v1 }
 0x2e6   :  { %555 = shalt.err (!%p552_p12)
}
 0x2e7   :  { %s556_s30 = scalar_lea.hbm %s733_s7, 256 }
 0x2e8   :  { %p557_p13 = scmp.ne.s32.totalorder %s733_s7, %s556_s30  ;;  %p560_p0 = scmp.lt.u32.totalorder %s556_s30, %s733_s7 }
 0x2ea   :  { %p562_p1 = pnand %p560_p0, %p557_p13 }
 0x2ec   :  { %565 = shalt.err (!%p562_p1)
}
 0x2ed   :  { %s576_s2 = smov 128   ;;  %s577_s3 = smov 8  }
 0x2ee   :  { %381 = dma.vmem_to_hbm [thread:$0]  %s376_s27, 256, %s733_s7, [#allocation4], %s576_s2, %s576_s2, %s577_s3  }
 0x2ef   :  { %568 = dma.done.wait [#allocation4], 256  }
 0x2f0   :  { %569 = vsyncadd [#allocation4], 4294967040 }
 0x2f1   :  { %385 = vsyncpa [#allocation3], 1 }
 0x2f2   :  { %386 = vsyncpa [#allocation4], 1 }

</bundles_post_ra>
